<compile_context>
chip_gen: v6e
topology: v6e:2x2x1
jax: 0.10.0
libtpu: 0.0.40
codegen_flags: <defaults>
</compile_context>

<pallas_src>
import functools

import jax
import jax.numpy as jnp
from jax.experimental import pallas as pl
from jax.experimental.pallas import tpu as pltpu


def _round_up(x, m):
    return (x + m - 1) // m * m


def _temporal_link_kernel(featu_ref, featv_ref, dts_ref,
                          w1f_ref, w1t_ref, b1_ref, w2_ref, b2_ref,
                          out_ref):
    """One grid step handles `tm` (u, v, t) queries.

    embed_u = relu(featu @ W1f + dtu * w1t + b1)
    embed_v = relu(featv @ W1f + dtv * w1t + b1)
    logit   = sum_f(embed_u * w2u + embed_v * w2v) + b2
    """
    tm = featu_ref.shape[0]

    # --- single stacked MXU matmul for both encoders (bf16 in, f32 acc) -----
    feats = jnp.concatenate([featu_ref[...], featv_ref[...]], axis=0)   # (2*tm, F) bf16
    z = jnp.dot(feats, w1f_ref[...],
                preferred_element_type=jnp.float32)                      # (2*tm, F) f32

    # --- f32 epilogue: time column, bias, ReLU ------------------------------
    w1t = w1t_ref[...]                     # (1, F)
    b1 = b1_ref[...]                       # (1, F)
    dtu = dts_ref[:, 0:1]                  # (tm, 1)
    dtv = dts_ref[:, 1:2]                  # (tm, 1)

    eu = jnp.maximum(z[:tm, :] + dtu * w1t + b1, 0.0)    # (tm, F) f32
    ev = jnp.maximum(z[tm:, :] + dtv * w1t + b1, 0.0)    # (tm, F) f32

    # --- final Linear(2F, 1) (dropout = identity in eval mode) --------------
    # VPU weighting by the split fc weight rows, then reduce over F with a
    # ones-row NT matmul so the result is already lane-major (1, tm): keeps the
    # output store lane-dense without any sublane->lane relayout.
    s = eu * w2_ref[0:1, :] + ev * w2_ref[1:2, :]         # (tm, F) f32
    ones = jnp.ones((1, s.shape[1]), jnp.float32)
    row = jax.lax.dot_general(
        ones, s, dimension_numbers=(((1,), (1,)), ((), ())),
        preferred_element_type=jnp.float32)               # (1, tm)
    out_ref[...] = (row + b2_ref[0, 0]).astype(out_ref.dtype)


@functools.partial(jax.jit, static_argnames=("tm",))
def temporal_link_layer(featu, featv, dtu, dtv, params, *, tm=512):
    """TemporalLinkLayer forward. Returns (N,) logits."""
    N, F = featu.shape
    w1f, w1t, b1, w2, b2 = params

    # Row tile: multiple of 128 (lane-dense output + MXU-friendly M), capped for
    # small N.  Inputs are zero-padded to a multiple of the tile; padded rows
    # are sliced off the result.
    tm_eff = _round_up(min(tm, _round_up(N, 128)), 128)
    n_pad = _round_up(N, tm_eff)
    grid = n_pad // tm_eff
    pad = n_pad - N

    featu_p = jnp.pad(featu.astype(jnp.bfloat16), ((0, pad), (0, 0)))
    featv_p = jnp.pad(featv.astype(jnp.bfloat16), ((0, pad), (0, 0)))
    dts = jnp.stack([dtu.reshape(-1).astype(jnp.float32),
                     dtv.reshape(-1).astype(jnp.float32)], axis=1)       # (N, 2)
    dts = jnp.pad(dts, ((0, pad), (0, 0)))                               # (n_pad, 2)

    w1f_b = w1f.astype(jnp.bfloat16)
    w1t = w1t.astype(jnp.float32)
    b1 = b1.astype(jnp.float32)
    w2 = w2.astype(jnp.float32)
    b2 = b2.astype(jnp.float32)

    feat_spec = pl.BlockSpec((tm_eff, F), lambda i: (i, 0))
    bcast = lambda shape: pl.BlockSpec(shape, lambda i: (0, 0))

    out = pl.pallas_call(
        _temporal_link_kernel,
        out_shape=jax.ShapeDtypeStruct((1, n_pad), jnp.float32),
        grid_spec=pltpu.PrefetchScalarGridSpec(
            num_scalar_prefetch=0,
            grid=(grid,),
            in_specs=[
                feat_spec,                                    # featu (bf16)
                feat_spec,                                    # featv (bf16)
                pl.BlockSpec((tm_eff, 2), lambda i: (i, 0)),  # [dtu, dtv]
                bcast((F, F)),                                # W1f   (bf16)
                bcast((1, F)),                                # w1t
                bcast((1, F)),                                # b1
                bcast((2, F)),                                # [w2u; w2v]
                pl.BlockSpec(memory_space=pltpu.MemorySpace.SMEM),  # b2 scalar
            ],
            out_specs=pl.BlockSpec((1, tm_eff), lambda i: (0, i)),  # lane-dense
        ),
        compiler_params=pltpu.CompilerParams(
            dimension_semantics=("parallel",)),
    )(featu_p, featv_p, dts, w1f_b, w1t, b1, w2, b2)

    return out.reshape(-1)[:N]


def init_params(key, in_features):
    """Parameters mirroring the PyTorch module shapes.

    fc1: Linear(in_features + 1, in_features)  (xavier_normal_ weight), split
         into W1f (F,F) + time column w1t (1,F), stored (in, out).
    fc : Linear(2*in_features, 1), weight split into rows [w2u; w2v] of (2, F).
    """
    F = in_features
    k1, k2, k3, k4 = jax.random.split(key, 4)

    std1 = (2.0 / ((F + 1) + F)) ** 0.5                   # xavier_normal_ std
    w1 = jax.random.normal(k1, (F + 1, F), jnp.float32) * std1   # (in+1, out)
    w1f = w1[:F, :]                                       # (F, F)
    w1t = w1[F:, :]                                       # (1, F)
    b1 = (jax.random.uniform(k2, (1, F), jnp.float32) - 0.5) * 0.1

    bound2 = 1.0 / (2 * F) ** 0.5
    w2 = jax.random.uniform(k3, (2, F), jnp.float32,
                            minval=-bound2, maxval=bound2)        # rows: u, v
    b2 = jax.random.uniform(k4, (1, 1), jnp.float32,
                            minval=-bound2, maxval=bound2)
    return (w1f, w1t, b1, w2, b2)


if __name__ == "__main__":
    key = jax.random.PRNGKey(0)
    F = 128          # in_features (module default)
    E = 64           # number of edges stored in the graph
    N = 16           # number of (u, v, t) queries

    k_fs, k_fd, k_ts, k_ids, k_t, k_p = jax.random.split(key, 6)

    # Synthetic graph edge data (g.edata[...]).
    src_feat = jax.random.normal(k_fs, (E, F), jnp.float32)
    dst_feat = jax.random.normal(k_fd, (E, F), jnp.float32)
    timestamp = jax.random.uniform(k_ts, (E,), jnp.float32, minval=0.0, maxval=10.0)

    src_eids = jax.random.randint(k_ids, (N,), 0, E)
    dst_eids = jax.random.randint(jax.random.fold_in(k_ids, 1), (N,), 0, E)
    t = jax.random.uniform(k_t, (N,), jnp.float32, minval=10.0, maxval=20.0)

    # Glue: the DGL-style gather is plain JAX indexing (not the hot path).
    featu = src_feat[src_eids]
    featv = dst_feat[dst_eids]
    dtu = t - timestamp[src_eids]
    dtv = t - timestamp[dst_eids]

    params = init_params(k_p, F)

    logits = temporal_link_layer(featu, featv, dtu, dtv, params, tm=512)
    jax.block_until_ready(logits)

    # Pure-JAX reference (matmul inputs bf16-cast exactly like the kernel's MXU path).
    w1f, w1t, b1, w2, b2 = params
    fu = featu.astype(jnp.bfloat16).astype(jnp.float32)
    fv = featv.astype(jnp.bfloat16).astype(jnp.float32)
    wf = w1f.astype(jnp.bfloat16).astype(jnp.float32)
    eu_ref = jnp.maximum(fu @ wf + dtu[:, None] * w1t + b1, 0.0)
    ev_ref = jnp.maximum(fv @ wf + dtv[:, None] * w1t + b1, 0.0)
    ref = jnp.sum(eu_ref * w2[0:1, :] + ev_ref * w2[1:2, :], axis=-1) + b2[0, 0]

    assert logits.shape == (N,)
    assert jnp.allclose(logits, ref, atol=2e-3, rtol=2e-3), \
        float(jnp.max(jnp.abs(logits - ref)))
    print("KERNEL_OK")
</pallas_src>

<mosaic_0001>
module attributes {stable_mosaic.version = 11 : i64} {
  func.func @_temporal_link_kernel(%arg0: i32, %arg1: memref<128x128xbf16, #tpu.memory_space<vmem>>, %arg2: memref<128x128xbf16, #tpu.memory_space<vmem>>, %arg3: memref<128x2xf32, #tpu.memory_space<vmem>>, %arg4: memref<128x128xbf16, #tpu.memory_space<vmem>>, %arg5: memref<1x128xf32, #tpu.memory_space<vmem>>, %arg6: memref<1x128xf32, #tpu.memory_space<vmem>>, %arg7: memref<2x128xf32, #tpu.memory_space<vmem>>, %arg8: memref<1x1xf32, #tpu.memory_space<smem>>, %arg9: memref<1x128xf32, #tpu.memory_space<vmem>>) attributes {dimension_semantics = [#tpu.dimension_semantics<parallel>], iteration_bounds = array<i64: 1>, scalar_prefetch = 0 : i64, scratch_operands = 0 : i64, tpu.core_type = #tpu.core_type<tc>, window_params = [{transform_indices = @transform_0, window_bounds = array<i64: 128, 128>}, {transform_indices = @transform_1, window_bounds = array<i64: 128, 128>}, {transform_indices = @transform_2, window_bounds = array<i64: 128, 2>}, {pipeline_mode = #tpu.pipeline_mode<synchronous>, transform_indices = @transform_3, window_bounds = array<i64: 128, 128>}, {pipeline_mode = #tpu.pipeline_mode<synchronous>, transform_indices = @transform_4, window_bounds = array<i64: 1, 128>}, {pipeline_mode = #tpu.pipeline_mode<synchronous>, transform_indices = @transform_5, window_bounds = array<i64: 1, 128>}, {pipeline_mode = #tpu.pipeline_mode<synchronous>, transform_indices = @transform_6, window_bounds = array<i64: 2, 128>}, {transform_indices = @transform_7, window_bounds = array<i64: 1, 1>}, {transform_indices = @transform_8, window_bounds = array<i64: 1, 128>}]} {
    %c0 = arith.constant 0 : index
    %c0_0 = arith.constant 0 : index
    %0 = vector.load %arg1[%c0, %c0_0] : memref<128x128xbf16, #tpu.memory_space<vmem>>, vector<128x128xbf16>
    %c0_1 = arith.constant 0 : index
    %c0_2 = arith.constant 0 : index
    %1 = vector.load %arg2[%c0_1, %c0_2] : memref<128x128xbf16, #tpu.memory_space<vmem>>, vector<128x128xbf16>
    %2 = tpu.concatenate %0, %1 in 0 : vector<128x128xbf16>, vector<128x128xbf16> -> vector<256x128xbf16>
    %c0_3 = arith.constant 0 : index
    %c0_4 = arith.constant 0 : index
    %3 = vector.load %arg4[%c0_3, %c0_4] : memref<128x128xbf16, #tpu.memory_space<vmem>>, vector<128x128xbf16>
    %cst = arith.constant dense<0.000000e+00> : vector<256x128xf32>
    %4 = tpu.matmul %2, %3, %cst {dimension_numbers = #tpu.dot_dimension_numbers<[1], [0], [0], [1], [0, 0, 1, 1], [], []>} : vector<256x128xbf16>, vector<128x128xbf16>, vector<256x128xf32> -> vector<256x128xf32>
    %c0_5 = arith.constant 0 : index
    %c0_6 = arith.constant 0 : index
    %5 = vector.load %arg5[%c0_5, %c0_6] : memref<1x128xf32, #tpu.memory_space<vmem>>, vector<1x128xf32>
    %c0_7 = arith.constant 0 : index
    %c0_8 = arith.constant 0 : index
    %6 = vector.load %arg6[%c0_7, %c0_8] : memref<1x128xf32, #tpu.memory_space<vmem>>, vector<1x128xf32>
    %c0_9 = arith.constant 0 : index
    %c0_10 = arith.constant 0 : index
    %7 = vector.load %arg3[%c0_9, %c0_10] : memref<128x2xf32, #tpu.memory_space<vmem>>, vector<128x1xf32>
    %c0_11 = arith.constant 0 : index
    %c1 = arith.constant 1 : index
    %8 = vector.load %arg3[%c0_11, %c1] : memref<128x2xf32, #tpu.memory_space<vmem>>, vector<128x1xf32>
    %9 = vector.extract_strided_slice %4 {offsets = [0, 0], sizes = [128, 128], strides = [1, 1]} : vector<256x128xf32> to vector<128x128xf32>
    %10 = vector.broadcast %7 : vector<128x1xf32> to vector<128x128xf32>
    %11 = vector.broadcast %5 : vector<1x128xf32> to vector<128x128xf32>
    %12 = arith.mulf %10, %11 : vector<128x128xf32>
    %13 = arith.addf %9, %12 : vector<128x128xf32>
    %14 = vector.broadcast %6 : vector<1x128xf32> to vector<128x128xf32>
    %15 = arith.addf %13, %14 : vector<128x128xf32>
    %cst_12 = arith.constant 0.000000e+00 : f32
    %16 = vector.broadcast %cst_12 : f32 to vector<128x128xf32>
    %17 = arith.maximumf %15, %16 : vector<128x128xf32>
    %18 = vector.extract_strided_slice %4 {offsets = [128, 0], sizes = [128, 128], strides = [1, 1]} : vector<256x128xf32> to vector<128x128xf32>
    %19 = vector.broadcast %8 : vector<128x1xf32> to vector<128x128xf32>
    %20 = vector.broadcast %5 : vector<1x128xf32> to vector<128x128xf32>
    %21 = arith.mulf %19, %20 : vector<128x128xf32>
    %22 = arith.addf %18, %21 : vector<128x128xf32>
    %23 = vector.broadcast %6 : vector<1x128xf32> to vector<128x128xf32>
    %24 = arith.addf %22, %23 : vector<128x128xf32>
    %cst_13 = arith.constant 0.000000e+00 : f32
    %25 = vector.broadcast %cst_13 : f32 to vector<128x128xf32>
    %26 = arith.maximumf %24, %25 : vector<128x128xf32>
    %c0_14 = arith.constant 0 : index
    %c0_15 = arith.constant 0 : index
    %27 = vector.load %arg7[%c0_14, %c0_15] : memref<2x128xf32, #tpu.memory_space<vmem>>, vector<1x128xf32>
    %28 = vector.broadcast %27 : vector<1x128xf32> to vector<128x128xf32>
    %29 = arith.mulf %17, %28 : vector<128x128xf32>
    %c1_16 = arith.constant 1 : index
    %c0_17 = arith.constant 0 : index
    %30 = vector.load %arg7[%c1_16, %c0_17] : memref<2x128xf32, #tpu.memory_space<vmem>>, vector<1x128xf32>
    %31 = vector.broadcast %30 : vector<1x128xf32> to vector<128x128xf32>
    %32 = arith.mulf %26, %31 : vector<128x128xf32>
    %33 = arith.addf %29, %32 : vector<128x128xf32>
    %cst_18 = arith.constant 1.000000e+00 : f32
    %34 = vector.broadcast %cst_18 : f32 to vector<1x128xf32>
    %cst_19 = arith.constant dense<0.000000e+00> : vector<1x128xf32>
    %35 = tpu.matmul %34, %33, %cst_19 {dimension_numbers = #tpu.dot_dimension_numbers<[1], [1], [0], [0], [0, 0, 1, 0], [], []>} : vector<1x128xf32>, vector<128x128xf32>, vector<1x128xf32> -> vector<1x128xf32>
    %c0_20 = arith.constant 0 : index
    %c0_21 = arith.constant 0 : index
    %36 = memref.load %arg8[%c0_20, %c0_21] : memref<1x1xf32, #tpu.memory_space<smem>>
    %37 = vector.broadcast %36 : f32 to vector<1x128xf32>
    %38 = arith.addf %35, %37 : vector<1x128xf32>
    %c0_22 = arith.constant 0 : index
    %c0_23 = arith.constant 0 : index
    %39 = vector.load %arg9[%c0_22, %c0_23] : memref<1x128xf32, #tpu.memory_space<vmem>>, vector<1x128xf32>
    tpu.vector_store %arg9[%c0_22, %c0_23], %38 {strides = array<i32>} : memref<1x128xf32, #tpu.memory_space<vmem>>, vector<1x128xf32>,
    return
  }
  func.func @transform_0(%arg0: i32) -> (i32, i32) {
    %c0_i32 = arith.constant 0 : i32
    %c0_i32_0 = arith.constant 0 : i32
    return %arg0, %c0_i32 : i32, i32
  }
  func.func @transform_1(%arg0: i32) -> (i32, i32) {
    %c0_i32 = arith.constant 0 : i32
    %c0_i32_0 = arith.constant 0 : i32
    return %arg0, %c0_i32 : i32, i32
  }
  func.func @transform_2(%arg0: i32) -> (i32, i32) {
    %c0_i32 = arith.constant 0 : i32
    %c0_i32_0 = arith.constant 0 : i32
    return %arg0, %c0_i32 : i32, i32
  }
  func.func @transform_3(%arg0: i32) -> (i32, i32) {
    %c0_i32 = arith.constant 0 : i32
    %c0_i32_0 = arith.constant 0 : i32
    %c0_i32_1 = arith.constant 0 : i32
    return %c0_i32, %c0_i32_0 : i32, i32
  }
  func.func @transform_4(%arg0: i32) -> (i32, i32) {
    %c0_i32 = arith.constant 0 : i32
    %c0_i32_0 = arith.constant 0 : i32
    %c0_i32_1 = arith.constant 0 : i32
    return %c0_i32, %c0_i32_0 : i32, i32
  }
  func.func @transform_5(%arg0: i32) -> (i32, i32) {
    %c0_i32 = arith.constant 0 : i32
    %c0_i32_0 = arith.constant 0 : i32
    %c0_i32_1 = arith.constant 0 : i32
    return %c0_i32, %c0_i32_0 : i32, i32
  }
  func.func @transform_6(%arg0: i32) -> (i32, i32) {
    %c0_i32 = arith.constant 0 : i32
    %c0_i32_0 = arith.constant 0 : i32
    %c0_i32_1 = arith.constant 0 : i32
    return %c0_i32, %c0_i32_0 : i32, i32
  }
  func.func @transform_7(%arg0: i32) -> (i32, i32) {
    %c0_i32 = arith.constant 0 : i32
    %c0_i32_0 = arith.constant 0 : i32
    %c0_i32_1 = arith.constant 0 : i32
    return %c0_i32, %c0_i32_0 : i32, i32
  }
  func.func @transform_8(%arg0: i32) -> (i32, i32) {
    %c0_i32 = arith.constant 0 : i32
    %c0_i32_0 = arith.constant 0 : i32
    return %c0_i32, %arg0 : i32, i32
  }
}

</mosaic_0001>

<bundles_post_ra>
// kernel: temporal_link_layer.1
= control target key start
LH: loop header
LB: loop body
LE: loop exit
PB: predicated region body
PF: predicated region fallthrough
CT: control target
= control target key end

     0   :  { %v1007_v1 = vmov 0   ;;  %v1008_v8 = vmov 1   ;;  %v1457_v45 = vmov 0.0   ;;  %vm1010_vm0 = vmmov 0   ;;  %s1448_s3 = inlined_call_operand.vmem [shape: bf16[128,128], index: 3, kind: input, shape index: {}]   ;;  %s1449_s0 = inlined_call_operand.vmem [shape: bf16[128,128], index: 0, kind: input, shape index: {}]   ;;  %s1450_s2 = inlined_call_operand.vmem [shape: f32[128,2], index: 2, kind: input, shape index: {}]   ;;  %s1451_s1 = inlined_call_operand.vmem [shape: bf16[128,128], index: 1, kind: input, shape index: {}]   ;;  %s1452_s4 = inlined_call_operand.vmem [shape: f32[1,128], index: 4, kind: input, shape index: {}]   ;;  %s1453_s5 = inlined_call_operand.vmem [shape: f32[1,128], index: 5, kind: input, shape index: {}]   ;;  %s1454_s6 = inlined_call_operand.vmem [shape: f32[2,128], index: 6, kind: input, shape index: {}]   ;;  %s1455_s7 = inlined_call_operand.<no memory space> [shape: f32[1,1], index: 7, kind: input, shape index: {}]   ;;  %s1456_s8 = inlined_call_operand.vmem [shape: f32[1,128], index: 8, kind: output, shape index: {}]  }
   0x1   :  { %v983_v0 = vld [vmem:[%s1448_s3 + $0x38] sm:$0xff]   ;;  %980 = vset.pattern.permute.xlu1 %v1007_v1  ;;  %978 = vset.pattern.permute.xlu0 %v1007_v1  ;;  %v984_v2 = vld [vmem:[%s1448_s3 + $0x30] sm:$0xff]   ;;  %v985_v3 = vld [vmem:[%s1448_s3 + $0x28] sm:$0xff]  }
   0x2   :  { %890 = vmatprep.subr.bf16.mxu0 %v983_v0  ;;  %v986_v4 = vld [vmem:[%s1448_s3 + $0x20] sm:$0xff]   ;;  %v400_v6 = vld [vmem:[%s1450_s2 + $0x70] sm:$0xff]  ;;  %v987_v7 = vld [vmem:[%s1448_s3 + $0x18] sm:$0xff]   ;;  %938 = vmatprep.subr.mxu1 %v1457_v45 }
   0x3   :  { %891 = vmatpush3.bf16.msra.mxu0 %v983_v0  ;;  %v991_v5 = vld [vmem:[%s1449_s0] sm:$0xff]   ;;  %474 = vperm.xlu1 %980, %v400_v6   ;;  %v988_v9 = vld [vmem:[%s1448_s3 + $0x10] sm:$0xff]   ;;  %v399_v10 = vld [vmem:[%s1450_s2 + $0x68] sm:$0xff] }
   0x4   :  { %892 = vmatprep.subr.bf16.mxu0 %v984_v2  ;;  %906 = vmatprep.mubr.bf16.mxu0 %v991_v5  ;;  %v989_v11 = vld [vmem:[%s1448_s3 + $0x8] sm:$0xff]   ;;  %v401_v12 = vld [vmem:[%s1450_s2 + $0x78] sm:$0xff]  ;;  %v398_v13 = vld [vmem:[%s1450_s2 + $0x60] sm:$0xff] }
   0x5   :  { %479 = vperm.xlu0 %978, %v401_v12   ;;  %v990_v14 = vld [vmem:[%s1448_s3] sm:$0xff]   ;;  %v397_v15 = vld [vmem:[%s1450_s2 + $0x58] sm:$0xff]  ;;  %v992_v16 = vld [vmem:[%s1449_s0 + $0x8] sm:$0xff]   ;;  %970 = vmatprep.mubr.msk.f32.mxu1 %vm1010_vm0, %v1457_v45 }
   0x6   :  { %v396_v17 = vld [vmem:[%s1450_s2 + $0x50] sm:$0xff]  ;;  %v395_v19 = vld [vmem:[%s1450_s2 + $0x48] sm:$0xff]  ;;  %v994_v20 = vld [vmem:[%s1449_s0 + $0x18] sm:$0xff]  }
   0x7   :  { %893 = vmatpush3.bf16.msra.mxu0 %v984_v2  ;;  %981 = vset.pattern.permute.xlu1 %v1008_v8  ;;  %v993_v18 = vld [vmem:[%s1449_s0 + $0x10] sm:$0xff]   ;;  %v394_v21 = vld [vmem:[%s1450_s2 + $0x40] sm:$0xff]  ;;  %v393_v23 = vld [vmem:[%s1450_s2 + $0x38] sm:$0xff] }
   0x8   :  { %894 = vmatprep.subr.bf16.mxu0 %v985_v3  ;;  %615 = vperm.xlu1 %981, %v400_v6   ;;  %v995_v22 = vld [vmem:[%s1449_s0 + $0x20] sm:$0xff]   ;;  %v996_v24 = vld [vmem:[%s1449_s0 + $0x28] sm:$0xff]   ;;  %v392_v25 = vld [vmem:[%s1450_s2 + $0x30] sm:$0xff] }
   0x9   :  { %979 = vset.pattern.permute.xlu0 %v1008_v8  ;;  %v997_v26 = vld [vmem:[%s1449_s0 + $0x30] sm:$0xff]   ;;  %v391_v27 = vld [vmem:[%s1450_s2 + $0x28] sm:$0xff]  ;;  %v998_v28 = vld [vmem:[%s1449_s0 + $0x38] sm:$0xff]  }
   0xa   :  { %619 = vperm.xlu0 %979, %v401_v12   ;;  %v390_v29 = vld [vmem:[%s1450_s2 + $0x20] sm:$0xff]  ;;  %v389_v31 = vld [vmem:[%s1450_s2 + $0x18] sm:$0xff]  ;;  %v1000_v32 = vld [vmem:[%s1451_s1 + $0x8] sm:$0xff]  }
   0xb   :  { %895 = vmatpush3.bf16.msra.mxu0 %v985_v3  ;;  %v999_v30 = vld [vmem:[%s1451_s1] sm:$0xff]   ;;  %v388_v33 = vld [vmem:[%s1450_s2 + $0x10] sm:$0xff]  ;;  %v387_v35 = vld [vmem:[%s1450_s2 + $0x8] sm:$0xff] }
   0xc   :  { %896 = vmatprep.subr.bf16.mxu0 %v986_v4  ;;  %982 = vset.pattern.permute.xlu1 %v1007_v1  ;;  %v1001_v34 = vld [vmem:[%s1451_s1 + $0x10] sm:$0xff]   ;;  %v1002_v36 = vld [vmem:[%s1451_s1 + $0x18] sm:$0xff]   ;;  %v386_v37 = vld [vmem:[%s1450_s2] sm:$0xff] }
   0xd   :  { %469 = vperm.xlu1 %982, %v399_v10   ;;  %v1003_v38 = vld [vmem:[%s1451_s1 + $0x20] sm:$0xff]   ;;  %v1004_v39 = vld [vmem:[%s1451_s1 + $0x28] sm:$0xff]   ;;  %v1005_v40 = vld [vmem:[%s1451_s1 + $0x30] sm:$0xff]  }
   0xe   :  { %611 = vperm.xlu0 %979, %v399_v10   ;;  %v1006_v41 = vld [vmem:[%s1451_s1 + $0x38] sm:$0xff]  }
   0xf   :  { %897 = vmatpush3.bf16.msra.mxu0 %v986_v4 }
  0x10   :  { %898 = vmatprep.subr.bf16.mxu0 %v987_v7 }
  0x11   :  { %464 = vperm.xlu1 %982, %v398_v13  }
  0x12   :  { %607 = vperm.xlu0 %979, %v398_v13  }
  0x13   :  { %899 = vmatpush3.bf16.msra.mxu0 %v987_v7 }
  0x14   :  { %900 = vmatprep.subr.bf16.mxu0 %v988_v9 }
  0x15   :  { %459 = vperm.xlu1 %982, %v397_v15  }
  0x16   :  { %603 = vperm.xlu0 %979, %v397_v15  }
  0x17   :  { %901 = vmatpush3.bf16.msra.mxu0 %v988_v9 }
  0x18   :  { %902 = vmatprep.subr.bf16.mxu0 %v989_v11 }
  0x19   :  { %454 = vperm.xlu1 %982, %v396_v17  }
  0x1a   :  { %599 = vperm.xlu0 %979, %v396_v17  }
  0x1b   :  { %903 = vmatpush3.bf16.msra.mxu0 %v989_v11 }
  0x1c   :  { %904 = vmatprep.subr.bf16.mxu0 %v990_v14 }
  0x1d   :  { %449 = vperm.xlu1 %982, %v395_v19  }
  0x1e   :  { %595 = vperm.xlu0 %979, %v395_v19   ;;  %v1244_v19 = vld [vmem:[%s1452_s4] ss:$0 sm:$0xff] }
  0x1f   :  { %905 = vmatpush3.bf16.msra.mxu0 %v990_v14 }
  0x21   :  { %444 = vperm.xlu1 %982, %v394_v21  }
  0x22   :  { %907 = vmatmul.mubr.bf16.vlgmr.msra.gmra.mxu0 %v992_v16  ;;  %591 = vperm.xlu0 %979, %v394_v21  }
  0x23   :  { %910 = vmatprep.mubr.bf16.mxu0 %v993_v18 }
  0x25   :  { %439 = vperm.xlu1 %982, %v393_v23  }
  0x26   :  { %587 = vperm.xlu0 %979, %v393_v23  }
  0x29   :  { %434 = vperm.xlu1 %982, %v392_v25  }
  0x2a   :  { %911 = vmatmul.mubr.bf16.gmra.mxu0 %v994_v20  ;;  %583 = vperm.xlu0 %979, %v392_v25  }
  0x2b   :  { %914 = vmatprep.mubr.bf16.mxu0 %v995_v22 }
  0x2d   :  { %429 = vperm.xlu1 %982, %v391_v27  }
  0x2e   :  { %579 = vperm.xlu0 %979, %v391_v27  }
  0x31   :  { %424 = vperm.xlu1 %982, %v390_v29  }
  0x32   :  { %915 = vmatmul.mubr.bf16.gmra.mxu0 %v996_v24  ;;  %575 = vperm.xlu0 %979, %v390_v29  }
  0x33   :  { %918 = vmatprep.mubr.bf16.mxu0 %v997_v26 }
  0x35   :  { %419 = vperm.xlu1 %982, %v389_v31  }
  0x36   :  { %571 = vperm.xlu0 %979, %v389_v31   ;;  %v1258_v31 = vld [vmem:[%s1453_s5] ss:$0 sm:$0xff] }
  0x39   :  { %414 = vperm.xlu1 %982, %v388_v33  }
  0x3a   :  { %919 = vmatmul.mubr.bf16.gmra.mxu0 %v998_v28  ;;  %567 = vperm.xlu0 %979, %v388_v33  }
  0x3b   :  { %922 = vmatprep.mubr.bf16.mxu0 %v999_v30 }
  0x3d   :  { %409 = vperm.xlu1 %982, %v387_v35  }
  0x3e   :  { %563 = vperm.xlu0 %979, %v387_v35  }
  0x41   :  { %404 = vperm.xlu1 %982, %v386_v37  }
  0x42   :  { %923 = vmatmul.mubr.bf16.gmra.mxu0 %v1000_v32  ;;  %559 = vperm.xlu0 %979, %v386_v37  }
  0x43   :  { %926 = vmatprep.mubr.bf16.mxu0 %v1001_v34 }
  0x4a   :  { %927 = vmatmul.mubr.bf16.gmra.mxu0 %v1002_v36 }
  0x4b   :  { %930 = vmatprep.mubr.bf16.mxu0 %v1003_v38 }
  0x52   :  { %931 = vmatmul.mubr.bf16.gmra.mxu0 %v1004_v39 }
  0x53   :  { %934 = vmatprep.mubr.bf16.mxu0 %v1005_v40 }
  0x5a   :  { %935 = vmatmul.mubr.bf16.gmra.mxu0 %v1006_v41 }
  0x7e   :  { %v1177_v42 = vpop.permute.xlu1 %474 }
  0x80   :  { %v1179_v43 = vpop.permute.xlu0 %479 }
  0x83   :  { %v1181_v44 = vpop.permute.xlu1 %615 }
  0x85   :  { %v1184_v46 = vpop.permute.xlu0 %619 }
  0x88   :  { %v1186_v47 = vpop.permute.xlu1 %469 }
  0x89   :  { %v1188_v48 = vpop.permute.xlu0 %611 }
  0x8c   :  { %v1190_v49 = vpop.permute.xlu1 %464 }
  0x8d   :  { %v1192_v50 = vpop.permute.xlu0 %607 }
  0x90   :  { %v1194_v51 = vpop.permute.xlu1 %459 }
  0x91   :  { %v1196_v52 = vpop.permute.xlu0 %603 }
  0x94   :  { %v1198_v53 = vpop.permute.xlu1 %454 }
  0x95   :  { %v1200_v54 = vpop.permute.xlu0 %599 }
  0x98   :  { %v1202_v55 = vpop.permute.xlu1 %449 }
  0x99   :  { %v1204_v56 = vpop.permute.xlu0 %595 }
  0x9c   :  { %v1206_v57 = vpop.permute.xlu1 %444 }
  0x9d   :  { %v1208_v58 = vpop.permute.xlu0 %591 }
  0xa0   :  { %v1210_v59 = vpop.permute.xlu1 %439 }
  0xa1   :  { %v1212_v60 = vpop.permute.xlu0 %587 }
  0xa4   :  { %v1214_v61 = vpop.permute.xlu1 %434 }
  0xa5   :  { %v1216_v62 = vpop.permute.xlu0 %583 }
  0xa8   :  { %v1218_v63 = vpop.permute.xlu1 %429 }
  0xa9   :  { %v1220_v0 = vpop.permute.xlu0 %579 }
  0xac   :  { %v1222_v1 = vpop.permute.xlu1 %424 }
  0xad   :  { %v1224_v5 = vpop.permute.xlu0 %575 }
  0xb0   :  { %v420_v6 = vpop.permute.xlu1 %419 }
  0xb1   :  { %v572_v10 = vpop.permute.xlu0 %571  ;;  %v491_v27 = vmul.f32 %v1244_v19, %v420_v6 }
  0xb2   :  { %v625_v40 = vmul.f32 %v1244_v19, %v572_v10  ;;  %v1279_v10 = vld [vmem:[%s1454_s6] ss:$0 sm:$0xff] }
  0xb4   :  { %v415_v11 = vpop.permute.xlu1 %414 }
  0xb5   :  { %v568_v15 = vpop.permute.xlu0 %567  ;;  %v490_v23 = vmul.f32 %v1244_v19, %v415_v11 }
  0xb6   :  { %v624_v32 = vmul.f32 %v1244_v19, %v568_v15 }
  0xb8   :  { %v410_v16 = vpop.permute.xlu1 %409 }
  0xb9   :  { %v564_v21 = vpop.permute.xlu0 %563  ;;  %v489_v33 = vmul.f32 %v1244_v19, %v410_v16 }
  0xba   :  { %v623_v15 = vmul.f32 %v1244_v19, %v564_v21 }
  0xbc   :  { %v405_v22 = vpop.permute.xlu1 %404 }
  0xbd   :  { %v488_v25 = vmul.f32 %v1244_v19, %v405_v22  ;;  %v560_v30 = vpop.permute.xlu0 %559 }
  0xbe   :  { %v622_v36 = vmul.f32 %v1244_v19, %v560_v30 }
  0xe2   :  { %v908_v2 = vpop.f32.mrf.mxu0 }
  0xe3   :  { %v506_v28 = vadd.f32 %v908_v2, %v490_v23 }
  0xe4   :  { %v257_v3 = vpop.f32.mrf.mxu0 }
  0xe5   :  { %v504_v34 = vadd.f32 %v488_v25, %v257_v3  ;;  %v528_v37 = vadd.f32 %v1258_v31, %v506_v28 }
  0xe6   :  { %v909_v4 = vpop.f32.mrf.mxu0 }
  0xe7   :  { %v507_v38 = vadd.f32 %v909_v4, %v491_v27  ;;  %v526_v2 = vadd.f32 %v1258_v31, %v504_v34  ;;  %v544_v22 = vmax.f32 %v528_v37, 0.0  ;;  %v1274_v4 = vld [vmem:[%s1454_s6 + $0x1] ss:$0 sm:$0xff] }
  0xe8   :  { %v260_v7 = vpop.f32.mrf.mxu0 }
  0xe9   :  { %v505_v6 = vadd.f32 %v489_v33, %v260_v7  ;;  %v529_v23 = vadd.f32 %v1258_v31, %v507_v38  ;;  %v542_v28 = vmax.f32 %v526_v2, 0.0  ;;  %v693_v38 = vmul.f32 %v1279_v10, %v544_v22 }
  0xea   :  { %v1227_v8 = vpop.f32.mrf.mxu0 }
  0xeb   :  { %v527_v30 = vadd.f32 %v1258_v31, %v505_v6  ;;  %v691_v2 = vmul.f32 %v1279_v10, %v542_v28 }
  0xec   :  { %v1229_v9 = vpop.f32.mrf.mxu0 }
  0xed   :  { %v543_v6 = vmax.f32 %v527_v30, 0.0 }
  0xee   :  { %v1231_v12 = vpop.f32.mrf.mxu0 }
  0xf0   :  { %v1233_v13 = vpop.f32.mrf.mxu0 }
  0xf2   :  { %v1235_v14 = vpop.f32.mrf.mxu0 }
  0xf4   :  { %v1237_v17 = vpop.f32.mrf.mxu0 }
  0xf6   :  { %v1239_v18 = vpop.f32.mrf.mxu0 }
  0xf8   :  { %v1246_v20 = vpop.f32.mrf.mxu0 }
  0xfa   :  { %v1249_v24 = vpop.f32.mrf.mxu0 }
  0xfc   :  { %v1252_v26 = vpop.f32.mrf.mxu0 }
  0xfe   :  { %v921_v29 = vpop.f32.mrf.mxu0 }
 0x100   :  { %v1262_v35 = vpop.f32.mrf.mxu0 }
 0x102   :  { %v924_v39 = vpop.f32.mrf.mxu0 }
 0x103   :  { %v640_v41 = vadd.f32 %v924_v39, %v624_v32  ;;  %v545_v39 = vmax.f32 %v529_v23, 0.0 }
 0x104   :  { %v321_v11 = vpop.f32.mrf.mxu0 }
 0x105   :  { %v656_v16 = vadd.f32 %v1258_v31, %v640_v41  ;;  %v638_v3 = vadd.f32 %v622_v36, %v321_v11  ;;  %v694_v22 = vmul.f32 %v1279_v10, %v545_v39  ;;  %v636_v39 = vmul.f32 %v1244_v19, %v1181_v44 }
 0x106   :  { %v925_v25 = vpop.f32.mrf.mxu0  ;;  %v635_v44 = vmul.f32 %v1244_v19, %v1188_v48  ;;  %v633_v48 = vmul.f32 %v1244_v19, %v1196_v52  ;;  %v632_v52 = vmul.f32 %v1244_v19, %v1200_v54  ;;  %v631_v54 = vmul.f32 %v1244_v19, %v1204_v56 }
 0x107   :  { %v672_v7 = vmax.f32 %v656_v16, 0.0  ;;  %v654_v21 = vadd.f32 %v1258_v31, %v638_v3  ;;  %v641_v27 = vadd.f32 %v925_v25, %v625_v40  ;;  %v630_v56 = vmul.f32 %v1244_v19, %v1208_v58 }
 0x108   :  { %v324_v32 = vpop.f32.mrf.mxu0  ;;  %v629_v58 = vmul.f32 %v1244_v19, %v1212_v60 }
 0x109   :  { %v714_v33 = vmul.f32 %v1274_v4, %v672_v7  ;;  %v670_v34 = vmax.f32 %v654_v21, 0.0  ;;  %v657_v36 = vadd.f32 %v1258_v31, %v641_v27  ;;  %v639_v37 = vadd.f32 %v623_v15, %v324_v32 }
 0x10a   :  { %v1286_v41 = vpop.f32.mrf.mxu0  ;;  %v692_v32 = vmul.f32 %v1279_v10, %v543_v6  ;;  %v637_v6 = vmul.f32 %v1244_v19, %v1184_v46  ;;  %v500_v46 = vmul.f32 %v1244_v19, %v1190_v49  ;;  %v499_v49 = vmul.f32 %v1244_v19, %v1194_v51 }
 0x10b   :  { %v712_v11 = vmul.f32 %v1274_v4, %v670_v34  ;;  %v673_v16 = vmax.f32 %v657_v36, 0.0  ;;  %v655_v40 = vadd.f32 %v1258_v31, %v639_v37  ;;  %v1293_v25 = vadd.f32 %v714_v33, %v693_v38 }
 0x10c   :  { %v1291_v3 = vpop.f32.mrf.mxu0  ;;  %v503_v37 = vmul.f32 %v1244_v19, %v1179_v43  ;;  %v501_v43 = vmul.f32 %v1244_v19, %v1186_v47  ;;  %v498_v51 = vmul.f32 %v1244_v19, %v1198_v53 }
 0x10d   :  { %v715_v7 = vmul.f32 %v1274_v4, %v673_v16  ;;  %v671_v15 = vmax.f32 %v655_v40, 0.0  ;;  %v1299_v21 = vadd.f32 %v712_v11, %v691_v2  ;;  %v502_v11 = vmul.f32 %v1244_v19, %v1177_v42 }
 0x10e   :  { %v1297_v23 = vpop.f32.mrf.mxu0  ;;  %v519_v40 = vadd.f32 %v921_v29, %v503_v37  ;;  %v634_v42 = vmul.f32 %v1244_v19, %v1192_v50  ;;  %v517_v47 = vadd.f32 %v501_v43, %v1262_v35 }
 0x10f   :  { %1459 = vst [vmem:[#allocation3_spill] sm:$0xff] %v1299_v21  ;;  %v713_v27 = vmul.f32 %v1274_v4, %v671_v15  ;;  %v1305_v28 = vadd.f32 %v715_v7, %v694_v22  ;;  %v518_v15 = vadd.f32 %v1249_v24, %v502_v11 }
 0x110   :  { %v1303_v34 = vpop.f32.mrf.mxu0 }
 0x111   :  { %v1307_v33 = vadd.f32 %v713_v27, %v692_v32  ;;  %v541_v27 = vadd.f32 %v1258_v31, %v519_v40  ;;  %v540_v24 = vadd.f32 %v1258_v31, %v518_v15 }
 0x112   :  { %v932_v30 = vpop.f32.mrf.mxu0 }
 0x113   :  { %v557_v11 = vmax.f32 %v541_v27, 0.0  ;;  %v556_v15 = vmax.f32 %v540_v24, 0.0  ;;  %v539_v27 = vadd.f32 %v1258_v31, %v517_v47  ;;  %v514_v47 = vadd.f32 %v1235_v14, %v498_v51 }
 0x114   :  { %v1309_v36 = vpop.f32.mrf.mxu0  ;;  %v496_v14 = vmul.f32 %v1244_v19, %v1206_v57 }
 0x115   :  { %v706_v35 = vmul.f32 %v1279_v10, %v557_v11 }
 0x116   :  { %v933_v38 = vpop.f32.mrf.mxu0 }
 0x118   :  { %v356_v16 = vpop.f32.mrf.mxu0 }
 0x11a   :  { %v936_v2 = vpop.f32.mrf.mxu0 }
 0x11b   :  { %v652_v7 = vadd.f32 %v936_v2, %v636_v39 }
 0x11c   :  { %v369_v22 = vpop.f32.mrf.mxu0 }
 0x11d   :  { %v668_v29 = vadd.f32 %v1258_v31, %v652_v7  ;;  %v650_v50 = vadd.f32 %v634_v42, %v369_v22  ;;  %v516_v7 = vadd.f32 %v500_v46, %v1252_v26  ;;  %v515_v26 = vadd.f32 %v1239_v18, %v499_v49 }
 0x11e   :  { %v937_v32 = vpop.f32.mrf.mxu0  ;;  %v497_v18 = vmul.f32 %v1244_v19, %v1202_v55 }
 0x11f   :  { %v653_v37 = vadd.f32 %v937_v32, %v637_v6  ;;  %v684_v45 = vmax.f32 %v668_v29, 0.0  ;;  %v649_v32 = vadd.f32 %v933_v38, %v633_v48  ;;  %v538_v46 = vadd.f32 %v1258_v31, %v516_v7 }
 0x120   :  { %v372_v39 = vpop.f32.mrf.mxu0  ;;  %v648_v38 = vadd.f32 %v932_v30, %v632_v52  ;;  %v536_v7 = vadd.f32 %v1258_v31, %v514_v47 }
 0x121   :  { %v669_v40 = vadd.f32 %v1258_v31, %v653_v37  ;;  %v651_v2 = vadd.f32 %v635_v44, %v372_v39  ;;  %v726_v22 = vmul.f32 %v1274_v4, %v684_v45  ;;  %v666_v44 = vadd.f32 %v1258_v31, %v650_v50 }
 0x122   :  { %v705_v37 = vmul.f32 %v1279_v10, %v556_v15  ;;  %v1460_v45 = vmov 0.0   ;;  %v665_v24 = vadd.f32 %v1258_v31, %v649_v32  ;;  %v664_v30 = vadd.f32 %v1258_v31, %v648_v38 }
 0x123   :  { %v685_v21 = vmax.f32 %v669_v40, 0.0  ;;  %v667_v6 = vadd.f32 %v1258_v31, %v651_v2  ;;  %v682_v39 = vmax.f32 %v666_v44, 0.0  ;;  %v537_v40 = vadd.f32 %v1258_v31, %v515_v26 }
 0x124   :  { %v742_v53 = vadd.f32 %v726_v22, %v705_v37  ;;  %v554_v2 = vmax.f32 %v538_v46, 0.0  ;;  %v681_v50 = vmax.f32 %v665_v24, 0.0  ;;  %v495_v22 = vmul.f32 %v1244_v19, %v1210_v59 }
 0x125   :  { %v727_v43 = vmul.f32 %v1274_v4, %v685_v21  ;;  %v683_v42 = vmax.f32 %v667_v6, 0.0  ;;  %v555_v21 = vmax.f32 %v539_v27, 0.0  ;;  %v647_v6 = vadd.f32 %v631_v54, %v356_v16 }
 0x126   :  { %v724_v49 = vmul.f32 %v1274_v4, %v682_v39  ;;  %v553_v15 = vmax.f32 %v537_v40, 0.0  ;;  %v513_v27 = vadd.f32 %v497_v18, %v1246_v20  ;;  %v680_v16 = vmax.f32 %v664_v30, 0.0 }
 0x127   :  { %v743_v29 = vadd.f32 %v727_v43, %v706_v35  ;;  %v725_v11 = vmul.f32 %v1274_v4, %v683_v42  ;;  %v704_v48 = vmul.f32 %v1279_v10, %v555_v21  ;;  %v703_v35 = vmul.f32 %v1279_v10, %v554_v2 }
 0x128   :  { %v646_v43 = vadd.f32 %v630_v56, %v1309_v36  ;;  %v723_v52 = vmul.f32 %v1274_v4, %v681_v50  ;;  %v663_v57 = vadd.f32 %v1258_v31, %v647_v6  ;;  %v552_v20 = vmax.f32 %v536_v7, 0.0 }
 0x129   :  { %939 = vmatpush3.xpose.msra.mxu1 %v743_v29  ;;  %v741_v55 = vadd.f32 %v725_v11, %v704_v48  ;;  %v740_v32 = vadd.f32 %v724_v49, %v703_v35  ;;  %v512_v44 = vadd.f32 %v496_v14, %v1237_v17  ;;  %v702_v42 = vmul.f32 %v1279_v10, %v553_v15 }
 0x12a   :  { %940 = vmatprep.subr.mxu1 %v1460_v45  ;;  %v535_v60 = vadd.f32 %v1258_v31, %v513_v27  ;;  %v628_v36 = vmul.f32 %v1244_v19, %v1216_v62  ;;  %v645_v29 = vadd.f32 %v1297_v23, %v629_v58  ;;  %v722_v51 = vmul.f32 %v1274_v4, %v680_v16 }
 0x12b   :  { %v662_v26 = vadd.f32 %v1258_v31, %v646_v43  ;;  %v679_v59 = vmax.f32 %v663_v57, 0.0  ;;  %v739_v37 = vadd.f32 %v723_v52, %v702_v42  ;;  %v494_v17 = vmul.f32 %v1244_v19, %v1214_v61 }
 0x12c   :  { %v511_v46 = vadd.f32 %v1231_v12, %v495_v22  ;;  %v701_v21 = vmul.f32 %v1279_v10, %v552_v20  ;;  %v534_v54 = vadd.f32 %v1258_v31, %v512_v44  ;;  %v551_v62 = vmax.f32 %v535_v60, 0.0 }
 0x12d   :  { %941 = vmatpush3.xpose.msra.mxu1 %v742_v53  ;;  %v627_v23 = vmul.f32 %v1244_v19, %v1220_v0  ;;  %v644_v38 = vadd.f32 %v1286_v41, %v628_v36  ;;  %v661_v24 = vadd.f32 %v1258_v31, %v645_v29  ;;  %v678_v39 = vmax.f32 %v662_v26, 0.0 }
 0x12e   :  { %942 = vmatprep.subr.mxu1 %v1460_v45  ;;  %v721_v61 = vmul.f32 %v1274_v4, %v679_v59  ;;  %v738_v11 = vadd.f32 %v722_v51, %v701_v21  ;;  %v493_v12 = vmul.f32 %v1244_v19, %v1218_v63  ;;  %v510_v53 = vadd.f32 %v1227_v8, %v494_v17 }
 0x12f   :  { %v533_v18 = vadd.f32 %v1258_v31, %v511_v46  ;;  %v550_v47 = vmax.f32 %v534_v54, 0.0  ;;  %v700_v0 = vmul.f32 %v1279_v10, %v551_v62  ;;  %v626_v41 = vmul.f32 %v1244_v19, %v1224_v5 }
 0x130   :  { %v660_v40 = vadd.f32 %v1258_v31, %v644_v38  ;;  %v677_v2 = vmax.f32 %v661_v24, 0.0  ;;  %v643_v48 = vadd.f32 %v627_v23, %v1303_v34  ;;  %v720_v63 = vmul.f32 %v1274_v4, %v678_v39 }
 0x131   :  { %943 = vmatpush3.xpose.msra.mxu1 %v741_v55  ;;  %v737_v56 = vadd.f32 %v721_v61, %v700_v0  ;;  %v492_v8 = vmul.f32 %v1244_v19, %v1222_v1  ;;  %v532_v30 = vadd.f32 %v1258_v31, %v510_v53  ;;  %v549_v50 = vmax.f32 %v533_v18, 0.0 }
 0x132   :  { %944 = vmatprep.subr.mxu1 %v1460_v45  ;;  %v509_v6 = vadd.f32 %v493_v12, %v1233_v13  ;;  %v699_v5 = vmul.f32 %v1279_v10, %v550_v47  ;;  %v642_v49 = vadd.f32 %v626_v41, %v1291_v3  ;;  %v676_v55 = vmax.f32 %v660_v40, 0.0 }
 0x133   :  { %v719_v34 = vmul.f32 %v1274_v4, %v677_v2  ;;  %v659_v14 = vadd.f32 %v1258_v31, %v643_v48  ;;  %v548_v15 = vmax.f32 %v532_v30, 0.0  ;;  %v508_v1 = vadd.f32 %v492_v8, %v1229_v9 }
 0x134   :  { %v736_v7 = vadd.f32 %v720_v63, %v699_v5  ;;  %v698_v19 = vmul.f32 %v1279_v10, %v549_v50  ;;  %v531_v13 = vadd.f32 %v1258_v31, %v509_v6  ;;  %v718_v3 = vmul.f32 %v1274_v4, %v676_v55 }
 0x135   :  { %945 = vmatpush3.xpose.msra.mxu1 %v740_v32  ;;  %v658_v27 = vadd.f32 %v1258_v31, %v642_v49  ;;  %v675_v35 = vmax.f32 %v659_v14, 0.0  ;;  %v697_v43 = vmul.f32 %v1279_v10, %v548_v15  ;;  %v530_v16 = vadd.f32 %v1258_v31, %v508_v1 }
 0x136   :  { %946 = vmatprep.subr.mxu1 %v1460_v45  ;;  %v735_v58 = vadd.f32 %v719_v34, %v698_v19  ;;  %v547_v52 = vmax.f32 %v531_v13, 0.0  ;;  %v745_v36 = vstv %s1455_s7 }
 0x137   :  { %v674_v9 = vmax.f32 %v658_v27, 0.0  ;;  %v717_v57 = vmul.f32 %v1274_v4, %v675_v35  ;;  %v734_v32 = vadd.f32 %v718_v3, %v697_v43  ;;  %v546_v22 = vmax.f32 %v530_v16, 0.0 }
 0x138   :  { %v696_v20 = vmul.f32 %v1279_v10, %v547_v52 }
 0x139   :  { %947 = vmatpush3.xpose.msra.mxu1 %v739_v37  ;;  %v716_v44 = vmul.f32 %v1274_v4, %v674_v9  ;;  %v695_v60 = vmul.f32 %v1279_v10, %v546_v22  ;;  %v1461_v4 = vld [vmem:[#allocation3_spill] sm:$0xff]  ;;  %v1011_v10 = vmov 1.0  }
 0x13a   :  { %948 = vmatprep.subr.mxu1 %v1460_v45  ;;  %v733_v42 = vadd.f32 %v717_v57, %v696_v20 }
 0x13b   :  { %v732_v31 = vadd.f32 %v716_v44, %v695_v60 }
 0x13d   :  { %949 = vmatpush3.xpose.msra.mxu1 %v738_v11 }
 0x13e   :  { %950 = vmatprep.subr.mxu1 %v1460_v45 }
 0x141   :  { %951 = vmatpush3.xpose.msra.mxu1 %v737_v56 }
 0x142   :  { %952 = vmatprep.subr.mxu1 %v1460_v45 }
 0x145   :  { %953 = vmatpush3.xpose.msra.mxu1 %v736_v7 }
 0x146   :  { %954 = vmatprep.subr.mxu1 %v1460_v45 }
 0x149   :  { %955 = vmatpush3.xpose.msra.mxu1 %v735_v58 }
 0x14a   :  { %956 = vmatprep.subr.mxu1 %v1460_v45 }
 0x14d   :  { %957 = vmatpush3.xpose.msra.mxu1 %v734_v32 }
 0x14e   :  { %958 = vmatprep.subr.mxu1 %v1460_v45 }
 0x151   :  { %959 = vmatpush3.xpose.msra.mxu1 %v733_v42 }
 0x152   :  { %960 = vmatprep.subr.mxu1 %v1460_v45 }
 0x155   :  { %961 = vmatpush3.xpose.msra.mxu1 %v732_v31 }
 0x156   :  { %962 = vmatprep.subr.mxu1 %v1460_v45 }
 0x159   :  { %963 = vmatpush3.xpose.msra.mxu1 %v1305_v28 }
 0x15a   :  { %964 = vmatprep.subr.mxu1 %v1460_v45 }
 0x15d   :  { %965 = vmatpush3.xpose.msra.mxu1 %v1293_v25 }
 0x15e   :  { %966 = vmatprep.subr.mxu1 %v1460_v45 }
 0x161   :  { %967 = vmatpush3.xpose.msra.mxu1 %v1307_v33 }
 0x162   :  { %968 = vmatprep.subr.mxu1 %v1460_v45 }
 0x165   :  { %969 = vmatpush3.xpose.msra.mxu1 %v1461_v4 }
 0x168   :  { %971 = vmatmul.mubr.f32.vlgmr.msra.gmra.mxu1 %v1011_v10 }
 0x228   :  { %v812_v29 = vpop.f32.mrf.mxu1 }
 0x229   :  { %v813_v28 = vadd.f32 %v812_v29, %v745_v36 }
 0x22a   :  { %v972_v51 = vpop.f32.mrf.mxu1 }
 0x22b   :  { %816 = vst [vmem:[%s1456_s8] sm:$0x1] %v813_v28 }

</bundles_post_ra>
